<compile_context>
chip_gen: v7x
topology: tpu7x:2x2x1
jax: 0.10.0
libtpu: 0.0.40
codegen_flags: <defaults>
</compile_context>

<pallas_src>
import functools

import jax
import jax.numpy as jnp
from jax.experimental import pallas as pl
from jax.experimental.pallas import tpu as pltpu


_VMEM_BUDGET_BYTES = 8 * 1024 * 1024  # conservative per-call working-set budget


def _round_up(x, k):
    return ((x + k - 1) // k) * k


def _relation_kernel(person_ref, others_ref, wk_ref, wo_ref, b_ref, out_ref, *, m):
    # person_ref: (TN, C)        others_ref: (TN*M, C)
    # wk_ref/wo_ref: (C, Cp)     b_ref: (1, Cp)      out_ref: (TN, Cp)
    tn = out_ref.shape[0]

    # "others" half of the linear layer: one big MXU matmul for the whole tile.
    oth = jnp.dot(others_ref[...], wo_ref[...],
                  preferred_element_type=jnp.float32)          # (TN*M, Cp)
    # Split the sublane dim (TN*M) -> (TN, M); with M a multiple of 8 and
    # Cp % 128 == 0 this is a pure re-indexing of vregs (no relayout).
    oth = oth.reshape(tn, m, -1)                               # (TN, M, Cp)
    oth_max = jnp.max(oth, axis=1)                             # (TN, Cp)

    # "person" half is constant over M: compute once per row and add after the
    # max (max_m(a_m + const) == max_m(a_m) + const).
    per = jnp.dot(person_ref[...], wk_ref[...],
                  preferred_element_type=jnp.float32)          # (TN, Cp)

    out_ref[...] = (oth_max + per + b_ref[...]).astype(out_ref.dtype)


def relation_block_batch(person_features, other_features, weight, bias):
    """person_features: (N, C, 1, 1); other_features: (N, M, C, 1, 1);
    weight: (C, 2C) torch layout (out, in); bias: (C,).  Returns (N, C, 1, 1)."""
    n, c, w, h = person_features.shape
    assert w == 1 and h == 1, "forward() squeezes spatial dims; they must be 1"
    m = other_features.shape[1]
    assert m >= 1
    feat_dtype = person_features.dtype

    c_out = weight.shape[0]               # == c for this module
    c_out_pad = _round_up(c_out, 128)     # lane-dense output columns
    pad_cols = c_out_pad - c_out

    # Split + transpose the torch-layout weight; pad output columns with zeros.
    # Concat order in the reference is (person, others), so the first C rows of
    # W^T multiply the person features.
    w_t = weight.T                                                        # (2C, C_out)
    wk = jnp.pad(w_t[:c], ((0, 0), (0, pad_cols))).astype(feat_dtype)     # (C, Cp)
    wo = jnp.pad(w_t[c:], ((0, 0), (0, pad_cols))).astype(feat_dtype)     # (C, Cp)
    b2 = jnp.pad(bias.astype(jnp.float32), (0, pad_cols)).reshape(1, c_out_pad)

    # Flatten features (no dtype upcast; MXU accumulates in f32).
    person2 = person_features.reshape(n, c)
    others2 = other_features.reshape(n * m, c)

    # --- choose the N tile ---------------------------------------------------
    itemsize = jnp.dtype(feat_dtype).itemsize
    # ~double-buffered bytes per batch row: others + person + f32 output tile
    per_row = 2 * (m * c * itemsize + c * itemsize + c_out_pad * 4)
    tn_cap = max(8, (_VMEM_BUDGET_BYTES // max(per_row, 1)) // 8 * 8)

    n_pad8 = _round_up(n, 8)
    if n_pad8 <= 16:
        tn = n_pad8
    else:
        # Aim for >=2 grid steps (megacore), cap tile size.
        tn = min(256, _round_up(pl.cdiv(n_pad8, 2), 8))
    tn = min(tn, tn_cap)
    n_pad = _round_up(n_pad8, tn)

    if n_pad != n:
        person2 = jnp.pad(person2, ((0, n_pad - n), (0, 0)))
        others2 = jnp.pad(others2, ((0, (n_pad - n) * m), (0, 0)))

    grid = (n_pad // tn,)

    out = pl.pallas_call(
        functools.partial(_relation_kernel, m=m),
        out_shape=jax.ShapeDtypeStruct((n_pad, c_out_pad), feat_dtype),
        grid=grid,
        in_specs=[
            pl.BlockSpec((tn, c), lambda i: (i, 0)),
            pl.BlockSpec((tn * m, c), lambda i: (i, 0)),
            pl.BlockSpec((c, c_out_pad), lambda i: (0, 0)),   # resident weights
            pl.BlockSpec((c, c_out_pad), lambda i: (0, 0)),
            pl.BlockSpec((1, c_out_pad), lambda i: (0, 0)),
        ],
        out_specs=pl.BlockSpec((tn, c_out_pad), lambda i: (i, 0)),
        compiler_params=pltpu.CompilerParams(
            dimension_semantics=("parallel",)),
    )(person2, others2, wk, wo, b2)

    return out[:n, :c_out].reshape(n, c_out, 1, 1)


def _reference(person_features, other_features, weight, bias):
    n, c, _, _ = person_features.shape
    m = other_features.shape[1]
    person = person_features.reshape(n, 1, c).astype(jnp.float32)
    others = other_features.reshape(n, m, c).astype(jnp.float32)
    key = jnp.broadcast_to(person, (n, m, c))
    x = jnp.concatenate([key, others], axis=-1)                  # (N, M, 2C)
    y = jnp.einsum("nmk,ck->nmc", x, weight.astype(jnp.float32)) + bias
    return jnp.max(y, axis=1).reshape(n, c, 1, 1)


if __name__ == "__main__":
    key = jax.random.PRNGKey(0)
    k1, k2, k3, k4 = jax.random.split(key, 4)

    N, MAX_OTHERS, DIM_INNER = 2, 8, 32

    person_features = jax.random.normal(k1, (N, DIM_INNER, 1, 1), dtype=jnp.float32)
    other_features = jax.random.normal(
        k2, (N, MAX_OTHERS, DIM_INNER, 1, 1), dtype=jnp.float32)

    # Deterministic Linear(2*dim_inner -> dim_inner) parameters (torch layout: (out, in))
    bound = 1.0 / (2 * DIM_INNER) ** 0.5
    weight = jax.random.uniform(
        k3, (DIM_INNER, 2 * DIM_INNER), minval=-bound, maxval=bound, dtype=jnp.float32)
    bias = jax.random.uniform(
        k4, (DIM_INNER,), minval=-bound, maxval=bound, dtype=jnp.float32)

    out = relation_block_batch(person_features, other_features, weight, bias)
    out = jax.block_until_ready(out)

    ref = _reference(person_features, other_features, weight, bias)
    assert out.shape == (N, DIM_INNER, 1, 1)
    assert jnp.allclose(out, ref, atol=1e-5, rtol=1e-5)

    print("KERNEL_OK")
</pallas_src>

<mosaic_0001>
module attributes {stable_mosaic.version = 11 : i64} {
  func.func @_relation_kernel(%arg0: i32, %arg1: memref<8x32xf32, #tpu.memory_space<vmem>>, %arg2: memref<64x32xf32, #tpu.memory_space<vmem>>, %arg3: memref<32x128xf32, #tpu.memory_space<vmem>>, %arg4: memref<32x128xf32, #tpu.memory_space<vmem>>, %arg5: memref<1x128xf32, #tpu.memory_space<vmem>>, %arg6: memref<8x128xf32, #tpu.memory_space<vmem>>) attributes {dimension_semantics = [#tpu.dimension_semantics<parallel>], iteration_bounds = array<i64: 1>, scalar_prefetch = 0 : i64, scratch_operands = 0 : i64, tpu.core_type = #tpu.core_type<tc>, window_params = [{transform_indices = @transform_0, window_bounds = array<i64: 8, 32>}, {transform_indices = @transform_1, window_bounds = array<i64: 64, 32>}, {pipeline_mode = #tpu.pipeline_mode<synchronous>, transform_indices = @transform_2, window_bounds = array<i64: 32, 128>}, {pipeline_mode = #tpu.pipeline_mode<synchronous>, transform_indices = @transform_3, window_bounds = array<i64: 32, 128>}, {pipeline_mode = #tpu.pipeline_mode<synchronous>, transform_indices = @transform_4, window_bounds = array<i64: 1, 128>}, {transform_indices = @transform_5, window_bounds = array<i64: 8, 128>}]} {
    %c0 = arith.constant 0 : index
    %c0_0 = arith.constant 0 : index
    %0 = vector.load %arg2[%c0, %c0_0] : memref<64x32xf32, #tpu.memory_space<vmem>>, vector<64x32xf32>
    %c0_1 = arith.constant 0 : index
    %c0_2 = arith.constant 0 : index
    %1 = vector.load %arg4[%c0_1, %c0_2] : memref<32x128xf32, #tpu.memory_space<vmem>>, vector<32x128xf32>
    %cst = arith.constant dense<0.000000e+00> : vector<64x128xf32>
    %2 = tpu.matmul %0, %1, %cst {dimension_numbers = #tpu.dot_dimension_numbers<[1], [0], [0], [1], [0, 0, 1, 1], [], []>} : vector<64x32xf32>, vector<32x128xf32>, vector<64x128xf32> -> vector<64x128xf32>
    %3 = vector.shape_cast %2 : vector<64x128xf32> to vector<8x8x128xf32>
    %cst_3 = arith.constant dense<0xFF800000> : vector<8x128xf32>
    %4 = vector.multi_reduction <maximumf>, %3, %cst_3 [1] : vector<8x8x128xf32> to vector<8x128xf32>
    %c0_4 = arith.constant 0 : index
    %c0_5 = arith.constant 0 : index
    %5 = vector.load %arg1[%c0_4, %c0_5] : memref<8x32xf32, #tpu.memory_space<vmem>>, vector<8x32xf32>
    %c0_6 = arith.constant 0 : index
    %c0_7 = arith.constant 0 : index
    %6 = vector.load %arg3[%c0_6, %c0_7] : memref<32x128xf32, #tpu.memory_space<vmem>>, vector<32x128xf32>
    %cst_8 = arith.constant dense<0.000000e+00> : vector<8x128xf32>
    %7 = tpu.matmul %5, %6, %cst_8 {dimension_numbers = #tpu.dot_dimension_numbers<[1], [0], [0], [1], [0, 0, 1, 1], [], []>} : vector<8x32xf32>, vector<32x128xf32>, vector<8x128xf32> -> vector<8x128xf32>
    %8 = arith.addf %4, %7 : vector<8x128xf32>
    %c0_9 = arith.constant 0 : index
    %c0_10 = arith.constant 0 : index
    %9 = vector.load %arg5[%c0_9, %c0_10] : memref<1x128xf32, #tpu.memory_space<vmem>>, vector<1x128xf32>
    %10 = vector.broadcast %9 : vector<1x128xf32> to vector<8x128xf32>
    %11 = arith.addf %8, %10 : vector<8x128xf32>
    %c0_11 = arith.constant 0 : index
    %c0_12 = arith.constant 0 : index
    %12 = vector.load %arg6[%c0_11, %c0_12] : memref<8x128xf32, #tpu.memory_space<vmem>>, vector<8x128xf32>
    tpu.vector_store %arg6[%c0_11, %c0_12], %11 {strides = array<i32>} : memref<8x128xf32, #tpu.memory_space<vmem>>, vector<8x128xf32>,
    return
  }
  func.func @transform_0(%arg0: i32) -> (i32, i32) {
    %c0_i32 = arith.constant 0 : i32
    %c0_i32_0 = arith.constant 0 : i32
    return %arg0, %c0_i32 : i32, i32
  }
  func.func @transform_1(%arg0: i32) -> (i32, i32) {
    %c0_i32 = arith.constant 0 : i32
    %c0_i32_0 = arith.constant 0 : i32
    return %arg0, %c0_i32 : i32, i32
  }
  func.func @transform_2(%arg0: i32) -> (i32, i32) {
    %c0_i32 = arith.constant 0 : i32
    %c0_i32_0 = arith.constant 0 : i32
    %c0_i32_1 = arith.constant 0 : i32
    return %c0_i32, %c0_i32_0 : i32, i32
  }
  func.func @transform_3(%arg0: i32) -> (i32, i32) {
    %c0_i32 = arith.constant 0 : i32
    %c0_i32_0 = arith.constant 0 : i32
    %c0_i32_1 = arith.constant 0 : i32
    return %c0_i32, %c0_i32_0 : i32, i32
  }
  func.func @transform_4(%arg0: i32) -> (i32, i32) {
    %c0_i32 = arith.constant 0 : i32
    %c0_i32_0 = arith.constant 0 : i32
    %c0_i32_1 = arith.constant 0 : i32
    return %c0_i32, %c0_i32_0 : i32, i32
  }
  func.func @transform_5(%arg0: i32) -> (i32, i32) {
    %c0_i32 = arith.constant 0 : i32
    %c0_i32_0 = arith.constant 0 : i32
    return %arg0, %c0_i32 : i32, i32
  }
}

</mosaic_0001>

<bundles_post_ra>
// kernel: tpu_custom_call.1
= control target key start
LH: loop header
LB: loop body
LE: loop exit
PB: predicated region body
PF: predicated region fallthrough
CT: control target
= control target key end

     0   :  { %vm33_vm0 = vcmask 261120   ;;  %v473_v6 = vmov 0.0|0.0   ;;  %vm474_vm1 = vmmov 0   ;;  %v475_v10 = vmov 0.0   ;;  %s593_s0 = inlined_call_operand.vmem [shape: f32[8,32], index: 0, kind: input, shape index: {}]   ;;  %s594_s1 = inlined_call_operand.vmem [shape: f32[64,32], index: 1, kind: input, shape index: {}]   ;;  %s595_s2 = inlined_call_operand.vmem [shape: f32[32,128], index: 2, kind: input, shape index: {}]   ;;  %s596_s3 = inlined_call_operand.vmem [shape: f32[32,128], index: 3, kind: input, shape index: {}]   ;;  %s597_s4 = inlined_call_operand.vmem [shape: f32[1,128], index: 4, kind: input, shape index: {}]   ;;  %s598_s5 = inlined_call_operand.hbm [shape: f32[8,128], index: 5, kind: output, shape index: {}]  }
   0x1   :  { %v29_v0 = vld [vmem:[%s596_s3] sm:$0xff]  ;;  %v30_v1 = vld [vmem:[%s596_s3 + $0x8] sm:$0xff]  ;;  %v31_v2 = vld [vmem:[%s596_s3 + $0x10] sm:$0xff]  ;;  %439 = vmatprep.subr.bf16.mxu1 %v473_v6  ;;  %428 = vmatprep.mubr.msk.f32.mxu1 %vm474_vm1, %v475_v10 }
   0x2   :  { %v431_v3 = vpack.c.bf16 %v30_v1, %v29_v0  ;;  %v32_v4 = vld [vmem:[%s596_s3 + $0x18] sm:$0xff]  ;;  %v21_v5 = vld [vmem:[%s594_s1] sm:$0xff]  ;;  %v213_v9 = vld [vmem:[%s595_s2 + $0x8] sm:$0xff] }
   0x3   :  { %v435_v7 = vpack.c.bf16 %v32_v4, %v31_v2  ;;  %408 = vmatprep.mubr.msk.f32.mxu0 %vm33_vm0, %v21_v5  ;;  %v212_v8 = vld [vmem:[%s595_s2] sm:$0xff]  ;;  %v214_v12 = vld [vmem:[%s595_s2 + $0x10] sm:$0xff]  ;;  %v215_v13 = vld [vmem:[%s595_s2 + $0x18] sm:$0xff] }
   0x4   :  { %432 = vmatprep.subr.bf16.mxu0 %v431_v3  ;;  %v440_v11 = vpack.c.bf16 %v213_v9, %v212_v8  ;;  %v443_v14 = vpack.c.bf16 %v215_v13, %v214_v12 }
   0x5   :  { %434 = vmatpush3.bf16.msra.mxu0 %v431_v3 }
   0x6   :  { %436 = vmatprep.subr.bf16.mxu0 %v435_v7  ;;  %441 = vmatpush3.bf16.msra.mxu1 %v440_v11 }
   0x7   :  { %10 = vsyncpa [#allocation3], 0  ;;  %442 = vmatprep.subr.bf16.mxu1 %v473_v6  ;;  %v22_v15 = vld [vmem:[%s594_s1 + $0x8] sm:$0xff]  ;;  %v23_v16 = vld [vmem:[%s594_s1 + $0x10] sm:$0xff]  ;;  %vm337_vm2 = vcmask 1041409   ;;  %vm340_vm3 = vcmask 1042434  }
   0x8   :  { %v211_v17 = vld [vmem:[%s593_s0] sm:$0xff]  ;;  %v24_v18 = vld [vmem:[%s594_s1 + $0x18] sm:$0xff]  ;;  %v26_v20 = vld [vmem:[%s594_s1 + $0x28] sm:$0xff]  ;;  %vm343_vm4 = vcmask 1043459   ;;  %vm346_vm5 = vcmask 1044484   ;;  %vm349_vm6 = vcmask 1045509  }
   0x9   :  { %438 = vmatpush3.bf16.msra.mxu0 %v435_v7  ;;  %v25_v19 = vld [vmem:[%s594_s1 + $0x20] sm:$0xff]  ;;  %v27_v21 = vld [vmem:[%s594_s1 + $0x30] sm:$0xff]  ;;  %v28_v22 = vld [vmem:[%s594_s1 + $0x38] sm:$0xff]  ;;  %vm352_vm7 = vcmask 1046534   ;;  %vm355_vm8 = vcmask 1047559  }
   0xa   :  { %444 = vmatpush3.bf16.msra.mxu1 %v443_v14  ;;  %v382_v59 = vld [vmem:[%s597_s4] ss:$0 sm:$0xff]  ;;  %s476_s4 = smov [#allocation2]  }
   0xb   :  { %s365_s25 = sshll.u32 %s476_s4, 4  ;;  %s366_s25 = int_to_ptr.vmem [resolvable:$true] %s365_s25 }
   0xc   :  { %409 = vmatmul.mubr.msk.f32.vlgmr.msra.gmra.mrb[0].mxu0 %vm33_vm0, %v22_v15  ;;  %s449_s26 = scalar_lea.vmem %s366_s25, 128  ;;  %p454_p1 = scmp.lt.s32.totalorder %s366_s25, %s366_s25 }
   0xd   :  { %411 = vmatprep.mubr.msk.f32.mxu0 %vm33_vm0, %v23_v16  ;;  %429 = vmatmul.mubr.msk.f32.vlgmr.msra.gmra.mrb[0].mxu1 %vm33_vm0, %v211_v17  ;;  %p450_p0 = scmp.ne.s32.totalorder %s366_s25, %s449_s26  ;;  %p455_p2 = scmp.lt.s32.totalorder %s449_s26, %s449_s26 }
   0xf   :  { %p456_p3 = por %p455_p2, %p454_p1 }
  0x10   :  { %412 = vmatmul.mubr.msk.f32.gmra.mrb[2].mxu0 %vm33_vm0, %v24_v18 }
  0x11   :  { %414 = vmatprep.mubr.msk.f32.mxu0 %vm33_vm0, %v25_v19  ;;  %p457_p4 = pnand %p456_p3, %p450_p0 }
  0x14   :  { %415 = vmatmul.mubr.msk.f32.gmra.mrb[4].mxu0 %vm33_vm0, %v26_v20 }
  0x15   :  { %417 = vmatprep.mubr.msk.f32.mxu0 %vm33_vm0, %v27_v21 }
  0x18   :  { %418 = vmatmul.mubr.msk.f32.gmra.mrb[6].mxu0 %vm33_vm0, %v28_v22 }
  0xdf   :  { %v410_v23 = vpop.f32.mrb[0].mxu0 }
  0xe0   :  { %v169_v24 = vrot.slane %v410_v23, 4  ;;  %v124_v25 = vpop.f32.mrb[1].mxu0  ;;  %v567_v26 = vpop.f32.mrb[0].mxu1 }
  0xe1   :  { %v163_v27 = vrot.slane %v124_v25, 4  ;;  %v430_v28 = vpop.f32.mrb[1].mxu1  ;;  %v290_v46 = vrot.slane %v567_v26, 1  ;;  %v291_v50 = vrot.slane %v567_v26, 2  ;;  %v292_v54 = vrot.slane %v567_v26, 3 }
  0xe2   :  { %v170_v29 = vmax.f32 %v410_v23, %v169_v24  ;;  %v294_v60 = vrot.slane %v567_v26, 5  ;;  %v293_v20 = vrot.slane %v567_v26, 4 }
  0xe3   :  { %v164_v30 = vmax.f32 %v124_v25, %v163_v27  ;;  %v413_v31 = vpop.f32.mrb[2].mxu0 }
  0xe4   :  { %v171_v32 = vrot.slane %v170_v29, 2  ;;  %v181_v33 = vrot.slane %v413_v31, 4  ;;  %v134_v34 = vpop.f32.mrb[3].mxu0 }
  0xe5   :  { %v165_v35 = vrot.slane %v164_v30, 2  ;;  %v175_v36 = vrot.slane %v134_v34, 4 }
  0xe6   :  { %v172_v37 = vmax.f32 %v170_v29, %v171_v32  ;;  %v182_v38 = vmax.f32 %v413_v31, %v181_v33 }
  0xe7   :  { %v166_v39 = vmax.f32 %v164_v30, %v165_v35  ;;  %v176_v40 = vmax.f32 %v134_v34, %v175_v36  ;;  %v416_v41 = vpop.f32.mrb[4].mxu0  ;;  %v296_v36 = vrot.slane %v567_v26, 7 }
  0xe8   :  { %v173_v42 = vrot.slane %v172_v37, 1  ;;  %v183_v43 = vrot.slane %v182_v38, 2  ;;  %v193_v44 = vrot.slane %v416_v41, 4  ;;  %v144_v45 = vpop.f32.mrb[5].mxu0 }
  0xe9   :  { %v167_v47 = vrot.slane %v166_v39, 1  ;;  %v177_v48 = vrot.slane %v176_v40, 2  ;;  %v187_v49 = vrot.slane %v144_v45, 4 }
  0xea   :  { %v174_v51 = vmax.f32 %v172_v37, %v173_v42  ;;  %v184_v52 = vmax.f32 %v182_v38, %v183_v43  ;;  %v194_v53 = vmax.f32 %v416_v41, %v193_v44 }
  0xeb   :  { %v168_v55 = vmax.f32 %v166_v39, %v167_v47  ;;  %v178_v56 = vmax.f32 %v176_v40, %v177_v48  ;;  %v188_v57 = vmax.f32 %v144_v45, %v187_v49  ;;  %v419_v58 = vpop.f32.mrb[6].mxu0  ;;  %v295_v40 = vrot.slane %v567_v26, 6 }
  0xec   :  { %v185_v61 = vrot.slane %v184_v52, 1  ;;  %v195_v62 = vrot.slane %v194_v53, 2  ;;  %v306_v63 = vadd.f32 %v290_v46, %v174_v51  ;;  %v205_v0 = vrot.slane %v419_v58, 4  ;;  %v154_v1 = vpop.f32.mrb[7].mxu0 }
  0xed   :  { %v179_v2 = vrot.slane %v178_v56, 1  ;;  %v189_v3 = vrot.slane %v188_v57, 2  ;;  %v305_v4 = vadd.f32 %v567_v26, %v168_v55  ;;  %v199_v5 = vrot.slane %v154_v1, 4 }
  0xee   :  { %v186_v6 = vmax.f32 %v184_v52, %v185_v61  ;;  %v196_v7 = vmax.f32 %v194_v53, %v195_v62  ;;  %v206_v8 = vmax.f32 %v419_v58, %v205_v0  ;;  %v321_v9 = vadd.f32 %v382_v59, %v306_v63 }
  0xef   :  { %v180_v10 = vmax.f32 %v178_v56, %v179_v2  ;;  %v190_v11 = vmax.f32 %v188_v57, %v189_v3  ;;  %v200_v12 = vmax.f32 %v154_v1, %v199_v5  ;;  %v320_v13 = vadd.f32 %v382_v59, %v305_v4 }
  0xf0   :  { %v197_v14 = vrot.slane %v196_v7, 1  ;;  %v207_v15 = vrot.slane %v206_v8, 2  ;;  %v308_v16 = vadd.f32 %v292_v54, %v186_v6  ;;  %v336_v17 = vrot.slane %v321_v9, 7 }
  0xf1   :  { %v191_v18 = vrot.slane %v190_v11, 1  ;;  %v201_v19 = vrot.slane %v200_v12, 2  ;;  %v307_v21 = vadd.f32 %v291_v50, %v180_v10 }
  0xf2   :  { %v198_v22 = vmax.f32 %v196_v7, %v197_v14  ;;  %v208_v23 = vmax.f32 %v206_v8, %v207_v15  ;;  %v323_v24 = vadd.f32 %v382_v59, %v308_v16  ;;  %v338_v25 = vsel %vm337_vm2, %v336_v17, %v320_v13 }
  0xf3   :  { %v192_v27 = vmax.f32 %v190_v11, %v191_v18  ;;  %v202_v28 = vmax.f32 %v200_v12, %v201_v19  ;;  %v322_v29 = vadd.f32 %v382_v59, %v307_v21 }
  0xf4   :  { %v209_v30 = vrot.slane %v208_v23, 1  ;;  %v310_v31 = vadd.f32 %v294_v60, %v198_v22  ;;  %v342_v38 = vrot.slane %v323_v24, 5 }
  0xf5   :  { %v203_v32 = vrot.slane %v202_v28, 1  ;;  %v309_v33 = vadd.f32 %v293_v20, %v192_v27  ;;  %v339_v34 = vrot.slane %v322_v29, 6 }
  0xf6   :  { %v210_v35 = vmax.f32 %v208_v23, %v209_v30  ;;  %v325_v37 = vadd.f32 %v382_v59, %v310_v31 }
  0xf7   :  { %v204_v39 = vmax.f32 %v202_v28, %v203_v32  ;;  %v324_v41 = vadd.f32 %v382_v59, %v309_v33  ;;  %v341_v42 = vsel %vm340_vm3, %v339_v34, %v338_v25 }
  0xf8   :  { %v312_v43 = vadd.f32 %v296_v36, %v210_v35  ;;  %v344_v44 = vsel %vm343_vm4, %v342_v38, %v341_v42  ;;  %v348_v48 = vrot.slane %v325_v37, 3 }
  0xf9   :  { %v311_v45 = vadd.f32 %v295_v40, %v204_v39  ;;  %v345_v46 = vrot.slane %v324_v41, 4 }
  0xfa   :  { %v327_v47 = vadd.f32 %v382_v59, %v312_v43 }
  0xfb   :  { %v326_v49 = vadd.f32 %v382_v59, %v311_v45  ;;  %v347_v50 = vsel %vm346_vm5, %v345_v46, %v344_v44 }
  0xfc   :  { %v350_v51 = vsel %vm349_vm6, %v348_v48, %v347_v50  ;;  %v354_v53 = vrot.slane %v327_v47, 1 }
  0xfd   :  { %v351_v52 = vrot.slane %v326_v49, 2 }
  0xff   :  { %v353_v26 = vsel %vm352_vm7, %v351_v52, %v350_v51 }
 0x100   :  { %v356_v54 = vsel %vm355_vm8, %v354_v53, %v353_v26 }
 0x101   :  { %358 = vst [vmem:[#allocation2] sm:$0xff] %v356_v54 }
 0x102   :  { %460 = shalt.err (!%p457_p4)
}
 0x103   :  { %s461_s29 = scalar_lea.hbm %s598_s5, 128 }
 0x104   :  { %p462_p5 = scmp.ne.s32.totalorder %s598_s5, %s461_s29  ;;  %p465_p6 = scmp.lt.u32.totalorder %s461_s29, %s598_s5 }
 0x106   :  { %p467_p7 = pnand %p465_p6, %p462_p5 }
 0x108   :  { %470 = shalt.err (!%p467_p7)
}
 0x109   :  { %368 = dma.vmem_to_hbm [thread:$0]  %s366_s25, 128, %s598_s5, [#allocation3]  }
 0x10a   :  { %471 = dma.done.wait [#allocation3], 128  }
 0x10b   :  { %472 = vsyncadd [#allocation3], 4294967168 }
 0x10c   :  { %372 = vsyncpa [#allocation3], 1 }

</bundles_post_ra>
